<compile_context>
chip_gen: v7x
topology: tpu7x:2x2x1
jax: 0.10.0
libtpu: 0.0.40
codegen_flags: <defaults>
</compile_context>

<pallas_src>
import jax
import jax.numpy as jnp
import numpy as np
from jax.experimental import pallas as pl
from jax.experimental.pallas import tpu as pltpu


# ----------------------------------------------------------------------------
# helpers
# ----------------------------------------------------------------------------
def _round_up(x, m):
    return (x + m - 1) // m * m


def _pick_tb(B, block_b):
    tb = min(block_b, _round_up(B, 8))
    return max(8, (tb // 8) * 8)


def _const_spec(shape):
    """Whole-array block, same block for every grid step (stays VMEM-resident)."""
    nd = len(shape)
    return pl.BlockSpec(shape, lambda i, _n=nd: (0,) * _n)


def _batch_spec(tb, ncols):
    """Block over the batch axis, full feature axis."""
    return pl.BlockSpec((tb, ncols), lambda i: (i, 0))


def xavier_normal(key, fan_in, fan_out):
    std = (2.0 / (fan_in + fan_out)) ** 0.5
    # stored as [in, out] (transpose of torch's [out, in]; distribution symmetric)
    return std * jax.random.normal(key, (fan_in, fan_out), dtype=jnp.float32)


# ----------------------------------------------------------------------------
# fused forward kernel
#   per view v (packed params pv: cols [0,D)=gate, [D,D+H)=encoder,
#   [D+H,D+H+C+1)=classifier|confidence heads; bias in row D resp. H):
#     info  = sigmoid(x_v @ Wfi + bfi)
#     h     = relu((x_v * info) @ Wfe + bfe)        (dropout = identity, eval)
#     heads = h @ [Wcls | Wcf] + [bcls | bcf]       -> logit, conf
#     mmlogit += conf * (h @ Wmm[v*H:(v+1)*H])      (concat-free, conf pulled out)
#     loss  += mean(info) + mse(conf, softmax(logit)[label]) + mean(CE(logit))
#   finally: mmlogit += bmm ; loss += mean(CE(mmlogit))
# ----------------------------------------------------------------------------
def make_kernel(views, dims, H, C, B, TB, with_loss):
    needs_mask = (B % TB) != 0
    VH = views * H

    def kernel(*refs):
        it = iter(refs)
        onehot_ref = next(it) if with_loss else None
        view_refs = [(next(it), next(it)) for _ in range(views)]   # (x, packed)
        pmm_ref = next(it)                                         # (VH+1, C) bf16
        mmlogit_ref = next(it)                                     # out (TB, C)
        loss_ref = next(it) if with_loss else None                 # out (1, 1)

        pid = pl.program_id(0)

        if needs_mask:
            rows = jax.lax.broadcasted_iota(jnp.int32, (TB, 1), 0)
            maskf = (rows < (B - pid * TB)).astype(jnp.float32)

        def sum_all(x):                                            # (r,c) -> (1,1)
            return jnp.sum(jnp.sum(x, axis=-1, keepdims=True),
                           axis=-2, keepdims=True)

        pmm = pmm_ref[...]
        bmm = pmm[VH:VH + 1, :].astype(jnp.float32)

        if with_loss:
            oh = onehot_ref[...]
            if needs_mask:
                oh = oh * maskf

            def ce_and_pt(z):                                      # (TB,C) f32
                m = jnp.max(z, axis=-1, keepdims=True)
                lse = jnp.log(jnp.sum(jnp.exp(z - m), axis=-1, keepdims=True)) + m
                tl = jnp.sum(z * oh, axis=-1, keepdims=True)       # target logit
                return lse - tl, jnp.exp(tl - lse)                 # CE rows, p_target

            partial = jnp.zeros((1, 1), jnp.float32)

        mmlogit = jnp.zeros((TB, C), jnp.float32)

        for v in range(views):
            D = dims[v]
            x_ref, pv_ref = view_refs[v]
            x = x_ref[...]
            if needs_mask:
                x = x * maskf                                      # keep tail rows finite
            pv = pv_ref[...]                                       # packed bf16 params
            wfi = pv[:D, :D]
            bfi = pv[D:D + 1, :D].astype(jnp.float32)
            wfe = pv[:D, D:D + H]
            bfe = pv[D:D + 1, D:D + H].astype(jnp.float32)
            wh = pv[:H, D + H:]
            bh = pv[H:H + 1, D + H:].astype(jnp.float32)

            info = jax.nn.sigmoid(
                jnp.dot(x.astype(jnp.bfloat16), wfi,
                        preferred_element_type=jnp.float32) + bfi)
            h = jnp.maximum(
                jnp.dot((x * info).astype(jnp.bfloat16), wfe,
                        preferred_element_type=jnp.float32) + bfe, 0.0)
            # TODO(synk): dropout is eval-mode identity (F.dropout training=False);
            # training-mode dropout would need pltpu.prng_seed/prng_random_bits here.
            h16 = h.astype(jnp.bfloat16)
            heads = jnp.dot(h16, wh, preferred_element_type=jnp.float32) + bh
            logit = heads[:, :C]                                   # TCPLogit
            conf = heads[:, C:C + 1]                               # TCPConfidence

            # concat-free MM classifier: diag(conf)·h·W == conf ⊙ (h·W)
            mmlogit = mmlogit + conf * jnp.dot(
                h16, pmm[v * H:(v + 1) * H, :],
                preferred_element_type=jnp.float32)

            if with_loss:
                ce_v, pt_v = ce_and_pt(logit)
                diff2 = (conf - pt_v) ** 2
                if needs_mask:
                    info = info * maskf
                    ce_v = ce_v * maskf
                    diff2 = diff2 * maskf
                partial = (partial
                           + sum_all(info) * (1.0 / (B * D))       # mean(FeatureInfo)
                           + sum_all(diff2) * (1.0 / B)            # MSE(conf, p_target)
                           + sum_all(ce_v) * (1.0 / B))            # mean CE(TCPLogit)

        mmlogit = mmlogit + bmm
        mmlogit_ref[...] = mmlogit

        if with_loss:
            ce_mm, _ = ce_and_pt(mmlogit)
            if needs_mask:
                ce_mm = ce_mm * maskf
            partial = partial + sum_all(ce_mm) * (1.0 / B)         # mean CE(MMlogit)

            @pl.when(pid == 0)
            def _init():
                loss_ref[...] = jnp.zeros_like(loss_ref)

            loss_ref[...] += partial

    return kernel


# ----------------------------------------------------------------------------
# wrappers
# ----------------------------------------------------------------------------
def mmdynamic_forward(data_list, label_onehot, params, block_b=128):
    views = len(data_list)
    dims, H, C = params["dims"], params["hidden"], params["classes"]
    B = data_list[0].shape[0]
    tb = _pick_tb(B, block_b)

    inputs = [label_onehot]
    in_specs = [_batch_spec(tb, C)]
    for v in range(views):
        inputs += [data_list[v], params["view_packed"][v]]
        in_specs += [_batch_spec(tb, dims[v]),
                     _const_spec(params["view_packed"][v].shape)]
    inputs.append(params["mm_packed"])
    in_specs.append(_const_spec(params["mm_packed"].shape))

    out_shape = (jax.ShapeDtypeStruct((B, C), jnp.float32),   # MMlogit
                 jax.ShapeDtypeStruct((1, 1), jnp.float32))   # loss accumulator
    out_specs = (_batch_spec(tb, C),
                 pl.BlockSpec((1, 1), lambda i: (0, 0)))

    mmlogit, loss = pl.pallas_call(
        make_kernel(views, dims, H, C, B, tb, with_loss=True),
        grid=(pl.cdiv(B, tb),),
        in_specs=in_specs, out_specs=out_specs, out_shape=out_shape,
        compiler_params=pltpu.CompilerParams(
            dimension_semantics=("arbitrary",),     # loss block revisited each tile
            vmem_limit_bytes=32 * 1024 * 1024),
    )(*inputs)
    return loss[0, 0], mmlogit


def mmdynamic_infer(data_list, params, block_b=128):
    """Loss-free inference variant: no one-hot input, no CE/MSE/mean math."""
    views = len(data_list)
    dims, H, C = params["dims"], params["hidden"], params["classes"]
    B = data_list[0].shape[0]
    tb = _pick_tb(B, block_b)

    inputs, in_specs = [], []
    for v in range(views):
        inputs += [data_list[v], params["view_packed"][v]]
        in_specs += [_batch_spec(tb, dims[v]),
                     _const_spec(params["view_packed"][v].shape)]
    inputs.append(params["mm_packed"])
    in_specs.append(_const_spec(params["mm_packed"].shape))

    return pl.pallas_call(
        make_kernel(views, dims, H, C, B, tb, with_loss=False),
        grid=(pl.cdiv(B, tb),),
        in_specs=in_specs,
        out_specs=_batch_spec(tb, C),
        out_shape=jax.ShapeDtypeStruct((B, C), jnp.float32),
        compiler_params=pltpu.CompilerParams(
            dimension_semantics=("parallel",),      # batch tiles are independent
            vmem_limit_bytes=32 * 1024 * 1024),
    )(*inputs)


# ----------------------------------------------------------------------------
# deterministic parameter construction (xavier_normal weights, zero biases),
# packed per view into ONE bf16 buffer; MM classifier packed as [Wmm; bmm].
# ----------------------------------------------------------------------------
def build_params(key, in_dims, hidden_dim, num_class):
    # TODO(synk): only len(hidden_dim) == 1 supported (single-Linear MMClasifier),
    # matching the common MMDynamic configuration.
    H, C = hidden_dim[0], num_class
    views = len(in_dims)
    view_packed = []
    for D in in_dims:
        key, k1, k2, k3, k4 = jax.random.split(key, 5)
        wfi = xavier_normal(k1, D, D)
        wfe = xavier_normal(k2, D, H)
        wcls = xavier_normal(k3, H, C)
        wcf = xavier_normal(k4, H, 1)
        R = max(D, H) + 1
        pv = jnp.zeros((R, D + H + C + 1), jnp.float32)
        pv = pv.at[:D, :D].set(wfi)                    # gate weight; bias row D stays 0
        pv = pv.at[:D, D:D + H].set(wfe)               # encoder weight; bias row D stays 0
        pv = pv.at[:H, D + H:D + H + C].set(wcls)      # classifier head
        pv = pv.at[:H, D + H + C:].set(wcf)            # confidence head; bias row H stays 0
        view_packed.append(pv.astype(jnp.bfloat16))
    key, k5 = jax.random.split(key)
    wmm = xavier_normal(k5, views * H, C)
    pmm = jnp.zeros((views * H + 1, C), jnp.float32).at[:views * H].set(wmm)
    return {"dims": tuple(in_dims), "hidden": H, "classes": C,
            "view_packed": view_packed, "mm_packed": pmm.astype(jnp.bfloat16)}


# ----------------------------------------------------------------------------
# pure-JAX reference (same bf16 matmul-operand rounding) for a sanity check
# ----------------------------------------------------------------------------
def mmdynamic_reference(data_list, onehot, params):
    dims, H, C = params["dims"], params["hidden"], params["classes"]
    views = len(dims)
    pmm = params["mm_packed"].astype(jnp.float32)
    wmm, bmm = pmm[:views * H], pmm[views * H]
    label = jnp.argmax(onehot, axis=1)

    def dot16(a, w):
        return jnp.dot(a.astype(jnp.bfloat16), w.astype(jnp.bfloat16),
                       preferred_element_type=jnp.float32)

    def ce(z):
        lse = jax.scipy.special.logsumexp(z, axis=1)
        return lse - jnp.sum(z * onehot, axis=1)

    feats, loss = [], 0.0
    for v in range(views):
        D = dims[v]
        pv = params["view_packed"][v].astype(jnp.float32)
        wfi, bfi = pv[:D, :D], pv[D, :D]
        wfe, bfe = pv[:D, D:D + H], pv[D, D:D + H]
        wh, bh = pv[:H, D + H:], pv[H, D + H:]
        x = data_list[v]
        info = jax.nn.sigmoid(dot16(x, wfi) + bfi)
        h = jax.nn.relu(dot16(x * info, wfe) + bfe)
        heads = dot16(h, wh) + bh
        logit, conf = heads[:, :C], heads[:, C:C + 1]
        feats.append(h * conf)
        p = jax.nn.softmax(logit, axis=1)
        pt = jnp.take_along_axis(p, label[:, None], axis=1)[:, 0]
        loss = loss + jnp.mean(info) + jnp.mean((conf[:, 0] - pt) ** 2) + jnp.mean(ce(logit))
    mmlogit = dot16(jnp.concatenate(feats, axis=1), wmm) + bmm
    return loss + jnp.mean(ce(mmlogit)), mmlogit


if __name__ == "__main__":
    B = 16
    in_dims = (16, 24)          # two views
    hidden_dim = (32,)
    num_class = 4

    key = jax.random.PRNGKey(0)
    key, kx0, kx1, kl = jax.random.split(key, 4)
    data_list = [
        jax.random.normal(kx0, (B, in_dims[0]), dtype=jnp.float32),
        jax.random.normal(kx1, (B, in_dims[1]), dtype=jnp.float32),
    ]
    label = jax.random.randint(kl, (B,), 0, num_class)
    label_onehot = jax.nn.one_hot(label, num_class, dtype=jnp.float32)

    params = build_params(key, in_dims, hidden_dim, num_class)

    # training-mode forward: batch-tiled grid of 2 (TB=8), cross-tile loss accumulation
    mmloss, mmlogit = mmdynamic_forward(data_list, label_onehot, params, block_b=8)
    # loss-free inference variant
    mmlogit_inf = mmdynamic_infer(data_list, params, block_b=8)
    jax.block_until_ready((mmloss, mmlogit, mmlogit_inf))

    assert mmlogit.shape == (B, num_class)
    assert mmloss.shape == ()

    ref_loss, ref_logit = mmdynamic_reference(data_list, label_onehot, params)
    np.testing.assert_allclose(np.asarray(mmlogit), np.asarray(ref_logit),
                               rtol=2e-2, atol=2e-2)
    np.testing.assert_allclose(np.asarray(mmlogit_inf), np.asarray(ref_logit),
                               rtol=2e-2, atol=2e-2)
    np.testing.assert_allclose(float(mmloss), float(ref_loss), rtol=2e-2, atol=2e-2)

    print("KERNEL_OK")
</pallas_src>

<mosaic_0001>
module attributes {stable_mosaic.version = 11 : i64} {
  func.func @kernel(%arg0: i32, %arg1: memref<8x4xf32, #tpu.memory_space<vmem>>, %arg2: memref<8x16xf32, #tpu.memory_space<vmem>>, %arg3: memref<33x53xbf16, #tpu.memory_space<vmem>>, %arg4: memref<8x24xf32, #tpu.memory_space<vmem>>, %arg5: memref<33x61xbf16, #tpu.memory_space<vmem>>, %arg6: memref<65x4xbf16, #tpu.memory_space<vmem>>, %arg7: memref<8x4xf32, #tpu.memory_space<vmem>>, %arg8: memref<1x1xf32, #tpu.memory_space<vmem>>) attributes {dimension_semantics = [#tpu.dimension_semantics<arbitrary>], iteration_bounds = array<i64: 2>, scalar_prefetch = 0 : i64, scratch_operands = 0 : i64, tpu.core_type = #tpu.core_type<tc>, window_params = [{transform_indices = @transform_0, window_bounds = array<i64: 8, 4>}, {transform_indices = @transform_1, window_bounds = array<i64: 8, 16>}, {pipeline_mode = #tpu.pipeline_mode<synchronous>, transform_indices = @transform_2, window_bounds = array<i64: 33, 53>}, {transform_indices = @transform_3, window_bounds = array<i64: 8, 24>}, {pipeline_mode = #tpu.pipeline_mode<synchronous>, transform_indices = @transform_4, window_bounds = array<i64: 33, 61>}, {pipeline_mode = #tpu.pipeline_mode<synchronous>, transform_indices = @transform_5, window_bounds = array<i64: 65, 4>}, {transform_indices = @transform_6, window_bounds = array<i64: 8, 4>}, {pipeline_mode = #tpu.pipeline_mode<synchronous>, transform_indices = @transform_7, window_bounds = array<i64: 1, 1>}]} {
    %c0 = arith.constant 0 : index
    %c0_0 = arith.constant 0 : index
    %0 = vector.load %arg6[%c0, %c0_0] : memref<65x4xbf16, #tpu.memory_space<vmem>>, vector<65x4xbf16>
    %1 = vector.extract_strided_slice %0 {offsets = [64, 0], sizes = [1, 4], strides = [1, 1]} : vector<65x4xbf16> to vector<1x4xbf16>
    %2 = arith.extf %1 : vector<1x4xbf16> to vector<1x4xf32>
    %c0_1 = arith.constant 0 : index
    %c0_2 = arith.constant 0 : index
    %3 = vector.load %arg1[%c0_1, %c0_2] : memref<8x4xf32, #tpu.memory_space<vmem>>, vector<8x4xf32>
    %cst = arith.constant 0.000000e+00 : f32
    %4 = vector.broadcast %cst : f32 to vector<1x1xf32>
    %cst_3 = arith.constant 0.000000e+00 : f32
    %5 = vector.broadcast %cst_3 : f32 to vector<8x4xf32>
    %c0_4 = arith.constant 0 : index
    %c0_5 = arith.constant 0 : index
    %6 = vector.load %arg2[%c0_4, %c0_5] : memref<8x16xf32, #tpu.memory_space<vmem>>, vector<8x16xf32>
    %c0_6 = arith.constant 0 : index
    %c0_7 = arith.constant 0 : index
    %7 = vector.load %arg3[%c0_6, %c0_7] : memref<33x53xbf16, #tpu.memory_space<vmem>>, vector<33x53xbf16>
    %8 = vector.extract_strided_slice %7 {offsets = [0, 0], sizes = [16, 16], strides = [1, 1]} : vector<33x53xbf16> to vector<16x16xbf16>
    %9 = vector.extract_strided_slice %7 {offsets = [16, 0], sizes = [1, 16], strides = [1, 1]} : vector<33x53xbf16> to vector<1x16xbf16>
    %10 = arith.extf %9 : vector<1x16xbf16> to vector<1x16xf32>
    %11 = vector.extract_strided_slice %7 {offsets = [0, 16], sizes = [16, 32], strides = [1, 1]} : vector<33x53xbf16> to vector<16x32xbf16>
    %12 = vector.extract_strided_slice %7 {offsets = [16, 16], sizes = [1, 32], strides = [1, 1]} : vector<33x53xbf16> to vector<1x32xbf16>
    %13 = arith.extf %12 : vector<1x32xbf16> to vector<1x32xf32>
    %14 = vector.extract_strided_slice %7 {offsets = [0, 48], sizes = [32, 5], strides = [1, 1]} : vector<33x53xbf16> to vector<32x5xbf16>
    %15 = vector.extract_strided_slice %7 {offsets = [32, 48], sizes = [1, 5], strides = [1, 1]} : vector<33x53xbf16> to vector<1x5xbf16>
    %16 = arith.extf %15 : vector<1x5xbf16> to vector<1x5xf32>
    %17 = arith.truncf %6 : vector<8x16xf32> to vector<8x16xbf16>
    %cst_8 = arith.constant dense<0.000000e+00> : vector<8x16xf32>
    %18 = tpu.matmul %17, %8, %cst_8 {dimension_numbers = #tpu.dot_dimension_numbers<[1], [0], [0], [1], [0, 0, 1, 1], [], []>} : vector<8x16xbf16>, vector<16x16xbf16>, vector<8x16xf32> -> vector<8x16xf32>
    %19 = vector.broadcast %10 : vector<1x16xf32> to vector<8x16xf32>
    %20 = arith.addf %18, %19 : vector<8x16xf32>
    %21 = arith.negf %20 : vector<8x16xf32>
    %22 = math.exp %21 : vector<8x16xf32>
    %cst_9 = arith.constant 1.000000e+00 : f32
    %23 = vector.broadcast %cst_9 : f32 to vector<8x16xf32>
    %24 = arith.addf %23, %22 : vector<8x16xf32>
    %25 = arith.divf %23, %24 : vector<8x16xf32>
    %26 = arith.mulf %6, %25 : vector<8x16xf32>
    %27 = arith.truncf %26 : vector<8x16xf32> to vector<8x16xbf16>
    %cst_10 = arith.constant dense<0.000000e+00> : vector<8x32xf32>
    %28 = tpu.matmul %27, %11, %cst_10 {dimension_numbers = #tpu.dot_dimension_numbers<[1], [0], [0], [1], [0, 0, 1, 1], [], []>} : vector<8x16xbf16>, vector<16x32xbf16>, vector<8x32xf32> -> vector<8x32xf32>
    %29 = vector.broadcast %13 : vector<1x32xf32> to vector<8x32xf32>
    %30 = arith.addf %28, %29 : vector<8x32xf32>
    %cst_11 = arith.constant 0.000000e+00 : f32
    %31 = vector.broadcast %cst_11 : f32 to vector<8x32xf32>
    %32 = arith.maximumf %30, %31 : vector<8x32xf32>
    %33 = arith.truncf %32 : vector<8x32xf32> to vector<8x32xbf16>
    %cst_12 = arith.constant dense<0.000000e+00> : vector<8x5xf32>
    %34 = tpu.matmul %33, %14, %cst_12 {dimension_numbers = #tpu.dot_dimension_numbers<[1], [0], [0], [1], [0, 0, 1, 1], [], []>} : vector<8x32xbf16>, vector<32x5xbf16>, vector<8x5xf32> -> vector<8x5xf32>
    %35 = vector.broadcast %16 : vector<1x5xf32> to vector<8x5xf32>
    %36 = arith.addf %34, %35 : vector<8x5xf32>
    %37 = vector.extract_strided_slice %36 {offsets = [0, 0], sizes = [8, 4], strides = [1, 1]} : vector<8x5xf32> to vector<8x4xf32>
    %38 = vector.extract_strided_slice %36 {offsets = [0, 4], sizes = [8, 1], strides = [1, 1]} : vector<8x5xf32> to vector<8x1xf32>
    %39 = vector.extract_strided_slice %0 {offsets = [0, 0], sizes = [32, 4], strides = [1, 1]} : vector<65x4xbf16> to vector<32x4xbf16>
    %cst_13 = arith.constant dense<0.000000e+00> : vector<8x4xf32>
    %40 = tpu.matmul %33, %39, %cst_13 {dimension_numbers = #tpu.dot_dimension_numbers<[1], [0], [0], [1], [0, 0, 1, 1], [], []>} : vector<8x32xbf16>, vector<32x4xbf16>, vector<8x4xf32> -> vector<8x4xf32>
    %41 = vector.broadcast %38 : vector<8x1xf32> to vector<8x4xf32>
    %42 = arith.mulf %41, %40 : vector<8x4xf32>
    %43 = arith.addf %5, %42 : vector<8x4xf32>
    %cst_14 = arith.constant dense<0xFF800000> : vector<8xf32>
    %44 = vector.multi_reduction <maximumf>, %37, %cst_14 [1] : vector<8x4xf32> to vector<8xf32>
    %45 = vector.shape_cast %44 : vector<8xf32> to vector<8x1xf32>
    %46 = vector.broadcast %45 : vector<8x1xf32> to vector<8x4xf32>
    %47 = arith.subf %37, %46 : vector<8x4xf32>
    %48 = math.exp %47 : vector<8x4xf32>
    %cst_15 = arith.constant dense<0.000000e+00> : vector<8xf32>
    %49 = vector.multi_reduction <add>, %48, %cst_15 [1] : vector<8x4xf32> to vector<8xf32>
    %50 = vector.shape_cast %49 : vector<8xf32> to vector<8x1xf32>
    %51 = math.log %50 : vector<8x1xf32>
    %52 = arith.addf %51, %45 : vector<8x1xf32>
    %53 = arith.mulf %37, %3 : vector<8x4xf32>
    %cst_16 = arith.constant dense<0.000000e+00> : vector<8xf32>
    %54 = vector.multi_reduction <add>, %53, %cst_16 [1] : vector<8x4xf32> to vector<8xf32>
    %55 = vector.shape_cast %54 : vector<8xf32> to vector<8x1xf32>
    %56 = arith.subf %52, %55 : vector<8x1xf32>
    %57 = arith.subf %55, %52 : vector<8x1xf32>
    %58 = math.exp %57 : vector<8x1xf32>
    %59 = arith.subf %38, %58 : vector<8x1xf32>
    %60 = arith.mulf %59, %59 : vector<8x1xf32>
    %cst_17 = arith.constant dense<0.000000e+00> : vector<8xf32>
    %61 = vector.multi_reduction <add>, %25, %cst_17 [1] : vector<8x16xf32> to vector<8xf32>
    %62 = vector.shape_cast %61 : vector<8xf32> to vector<8x1xf32>
    %cst_18 = arith.constant dense<0.000000e+00> : vector<1xf32>
    %63 = vector.multi_reduction <add>, %62, %cst_18 [0] : vector<8x1xf32> to vector<1xf32>
    %64 = vector.shape_cast %63 : vector<1xf32> to vector<1x1xf32>
    %cst_19 = arith.constant 3.906250e-03 : f32
    %65 = vector.broadcast %cst_19 : f32 to vector<1x1xf32>
    %66 = arith.mulf %64, %65 : vector<1x1xf32>
    %67 = arith.addf %4, %66 : vector<1x1xf32>
    %cst_20 = arith.constant dense<0.000000e+00> : vector<8xf32>
    %68 = vector.multi_reduction <add>, %60, %cst_20 [1] : vector<8x1xf32> to vector<8xf32>
    %69 = vector.shape_cast %68 : vector<8xf32> to vector<8x1xf32>
    %cst_21 = arith.constant dense<0.000000e+00> : vector<1xf32>
    %70 = vector.multi_reduction <add>, %69, %cst_21 [0] : vector<8x1xf32> to vector<1xf32>
    %71 = vector.shape_cast %70 : vector<1xf32> to vector<1x1xf32>
    %cst_22 = arith.constant 6.250000e-02 : f32
    %72 = vector.broadcast %cst_22 : f32 to vector<1x1xf32>
    %73 = arith.mulf %71, %72 : vector<1x1xf32>
    %74 = arith.addf %67, %73 : vector<1x1xf32>
    %cst_23 = arith.constant dense<0.000000e+00> : vector<8xf32>
    %75 = vector.multi_reduction <add>, %56, %cst_23 [1] : vector<8x1xf32> to vector<8xf32>
    %76 = vector.shape_cast %75 : vector<8xf32> to vector<8x1xf32>
    %cst_24 = arith.constant dense<0.000000e+00> : vector<1xf32>
    %77 = vector.multi_reduction <add>, %76, %cst_24 [0] : vector<8x1xf32> to vector<1xf32>
    %78 = vector.shape_cast %77 : vector<1xf32> to vector<1x1xf32>
    %cst_25 = arith.constant 6.250000e-02 : f32
    %79 = vector.broadcast %cst_25 : f32 to vector<1x1xf32>
    %80 = arith.mulf %78, %79 : vector<1x1xf32>
    %81 = arith.addf %74, %80 : vector<1x1xf32>
    %c0_26 = arith.constant 0 : index
    %c0_27 = arith.constant 0 : index
    %82 = vector.load %arg4[%c0_26, %c0_27] : memref<8x24xf32, #tpu.memory_space<vmem>>, vector<8x24xf32>
    %c0_28 = arith.constant 0 : index
    %c0_29 = arith.constant 0 : index
    %83 = vector.load %arg5[%c0_28, %c0_29] : memref<33x61xbf16, #tpu.memory_space<vmem>>, vector<33x61xbf16>
    %84 = vector.extract_strided_slice %83 {offsets = [0, 0], sizes = [24, 24], strides = [1, 1]} : vector<33x61xbf16> to vector<24x24xbf16>
    %85 = vector.extract_strided_slice %83 {offsets = [24, 0], sizes = [1, 24], strides = [1, 1]} : vector<33x61xbf16> to vector<1x24xbf16>
    %86 = arith.extf %85 : vector<1x24xbf16> to vector<1x24xf32>
    %87 = vector.extract_strided_slice %83 {offsets = [0, 24], sizes = [24, 32], strides = [1, 1]} : vector<33x61xbf16> to vector<24x32xbf16>
    %88 = vector.extract_strided_slice %83 {offsets = [24, 24], sizes = [1, 32], strides = [1, 1]} : vector<33x61xbf16> to vector<1x32xbf16>
    %89 = arith.extf %88 : vector<1x32xbf16> to vector<1x32xf32>
    %90 = vector.extract_strided_slice %83 {offsets = [0, 56], sizes = [32, 5], strides = [1, 1]} : vector<33x61xbf16> to vector<32x5xbf16>
    %91 = vector.extract_strided_slice %83 {offsets = [32, 56], sizes = [1, 5], strides = [1, 1]} : vector<33x61xbf16> to vector<1x5xbf16>
    %92 = arith.extf %91 : vector<1x5xbf16> to vector<1x5xf32>
    %93 = arith.truncf %82 : vector<8x24xf32> to vector<8x24xbf16>
    %cst_30 = arith.constant dense<0.000000e+00> : vector<8x24xf32>
    %94 = tpu.matmul %93, %84, %cst_30 {dimension_numbers = #tpu.dot_dimension_numbers<[1], [0], [0], [1], [0, 0, 1, 1], [], []>} : vector<8x24xbf16>, vector<24x24xbf16>, vector<8x24xf32> -> vector<8x24xf32>
    %95 = vector.broadcast %86 : vector<1x24xf32> to vector<8x24xf32>
    %96 = arith.addf %94, %95 : vector<8x24xf32>
    %97 = arith.negf %96 : vector<8x24xf32>
    %98 = math.exp %97 : vector<8x24xf32>
    %cst_31 = arith.constant 1.000000e+00 : f32
    %99 = vector.broadcast %cst_31 : f32 to vector<8x24xf32>
    %100 = arith.addf %99, %98 : vector<8x24xf32>
    %101 = arith.divf %99, %100 : vector<8x24xf32>
    %102 = arith.mulf %82, %101 : vector<8x24xf32>
    %103 = arith.truncf %102 : vector<8x24xf32> to vector<8x24xbf16>
    %cst_32 = arith.constant dense<0.000000e+00> : vector<8x32xf32>
    %104 = tpu.matmul %103, %87, %cst_32 {dimension_numbers = #tpu.dot_dimension_numbers<[1], [0], [0], [1], [0, 0, 1, 1], [], []>} : vector<8x24xbf16>, vector<24x32xbf16>, vector<8x32xf32> -> vector<8x32xf32>
    %105 = vector.broadcast %89 : vector<1x32xf32> to vector<8x32xf32>
    %106 = arith.addf %104, %105 : vector<8x32xf32>
    %cst_33 = arith.constant 0.000000e+00 : f32
    %107 = vector.broadcast %cst_33 : f32 to vector<8x32xf32>
    %108 = arith.maximumf %106, %107 : vector<8x32xf32>
    %109 = arith.truncf %108 : vector<8x32xf32> to vector<8x32xbf16>
    %cst_34 = arith.constant dense<0.000000e+00> : vector<8x5xf32>
    %110 = tpu.matmul %109, %90, %cst_34 {dimension_numbers = #tpu.dot_dimension_numbers<[1], [0], [0], [1], [0, 0, 1, 1], [], []>} : vector<8x32xbf16>, vector<32x5xbf16>, vector<8x5xf32> -> vector<8x5xf32>
    %111 = vector.broadcast %92 : vector<1x5xf32> to vector<8x5xf32>
    %112 = arith.addf %110, %111 : vector<8x5xf32>
    %113 = vector.extract_strided_slice %112 {offsets = [0, 0], sizes = [8, 4], strides = [1, 1]} : vector<8x5xf32> to vector<8x4xf32>
    %114 = vector.extract_strided_slice %112 {offsets = [0, 4], sizes = [8, 1], strides = [1, 1]} : vector<8x5xf32> to vector<8x1xf32>
    %115 = vector.extract_strided_slice %0 {offsets = [32, 0], sizes = [32, 4], strides = [1, 1]} : vector<65x4xbf16> to vector<32x4xbf16>
    %cst_35 = arith.constant dense<0.000000e+00> : vector<8x4xf32>
    %116 = tpu.matmul %109, %115, %cst_35 {dimension_numbers = #tpu.dot_dimension_numbers<[1], [0], [0], [1], [0, 0, 1, 1], [], []>} : vector<8x32xbf16>, vector<32x4xbf16>, vector<8x4xf32> -> vector<8x4xf32>
    %117 = vector.broadcast %114 : vector<8x1xf32> to vector<8x4xf32>
    %118 = arith.mulf %117, %116 : vector<8x4xf32>
    %119 = arith.addf %43, %118 : vector<8x4xf32>
    %cst_36 = arith.constant dense<0xFF800000> : vector<8xf32>
    %120 = vector.multi_reduction <maximumf>, %113, %cst_36 [1] : vector<8x4xf32> to vector<8xf32>
    %121 = vector.shape_cast %120 : vector<8xf32> to vector<8x1xf32>
    %122 = vector.broadcast %121 : vector<8x1xf32> to vector<8x4xf32>
    %123 = arith.subf %113, %122 : vector<8x4xf32>
    %124 = math.exp %123 : vector<8x4xf32>
    %cst_37 = arith.constant dense<0.000000e+00> : vector<8xf32>
    %125 = vector.multi_reduction <add>, %124, %cst_37 [1] : vector<8x4xf32> to vector<8xf32>
    %126 = vector.shape_cast %125 : vector<8xf32> to vector<8x1xf32>
    %127 = math.log %126 : vector<8x1xf32>
    %128 = arith.addf %127, %121 : vector<8x1xf32>
    %129 = arith.mulf %113, %3 : vector<8x4xf32>
    %cst_38 = arith.constant dense<0.000000e+00> : vector<8xf32>
    %130 = vector.multi_reduction <add>, %129, %cst_38 [1] : vector<8x4xf32> to vector<8xf32>
    %131 = vector.shape_cast %130 : vector<8xf32> to vector<8x1xf32>
    %132 = arith.subf %128, %131 : vector<8x1xf32>
    %133 = arith.subf %131, %128 : vector<8x1xf32>
    %134 = math.exp %133 : vector<8x1xf32>
    %135 = arith.subf %114, %134 : vector<8x1xf32>
    %136 = arith.mulf %135, %135 : vector<8x1xf32>
    %cst_39 = arith.constant dense<0.000000e+00> : vector<8xf32>
    %137 = vector.multi_reduction <add>, %101, %cst_39 [1] : vector<8x24xf32> to vector<8xf32>
    %138 = vector.shape_cast %137 : vector<8xf32> to vector<8x1xf32>
    %cst_40 = arith.constant dense<0.000000e+00> : vector<1xf32>
    %139 = vector.multi_reduction <add>, %138, %cst_40 [0] : vector<8x1xf32> to vector<1xf32>
    %140 = vector.shape_cast %139 : vector<1xf32> to vector<1x1xf32>
    %cst_41 = arith.constant 0.00260416674 : f32
    %141 = vector.broadcast %cst_41 : f32 to vector<1x1xf32>
    %142 = arith.mulf %140, %141 : vector<1x1xf32>
    %143 = arith.addf %81, %142 : vector<1x1xf32>
    %cst_42 = arith.constant dense<0.000000e+00> : vector<8xf32>
    %144 = vector.multi_reduction <add>, %136, %cst_42 [1] : vector<8x1xf32> to vector<8xf32>
    %145 = vector.shape_cast %144 : vector<8xf32> to vector<8x1xf32>
    %cst_43 = arith.constant dense<0.000000e+00> : vector<1xf32>
    %146 = vector.multi_reduction <add>, %145, %cst_43 [0] : vector<8x1xf32> to vector<1xf32>
    %147 = vector.shape_cast %146 : vector<1xf32> to vector<1x1xf32>
    %cst_44 = arith.constant 6.250000e-02 : f32
    %148 = vector.broadcast %cst_44 : f32 to vector<1x1xf32>
    %149 = arith.mulf %147, %148 : vector<1x1xf32>
    %150 = arith.addf %143, %149 : vector<1x1xf32>
    %cst_45 = arith.constant dense<0.000000e+00> : vector<8xf32>
    %151 = vector.multi_reduction <add>, %132, %cst_45 [1] : vector<8x1xf32> to vector<8xf32>
    %152 = vector.shape_cast %151 : vector<8xf32> to vector<8x1xf32>
    %cst_46 = arith.constant dense<0.000000e+00> : vector<1xf32>
    %153 = vector.multi_reduction <add>, %152, %cst_46 [0] : vector<8x1xf32> to vector<1xf32>
    %154 = vector.shape_cast %153 : vector<1xf32> to vector<1x1xf32>
    %cst_47 = arith.constant 6.250000e-02 : f32
    %155 = vector.broadcast %cst_47 : f32 to vector<1x1xf32>
    %156 = arith.mulf %154, %155 : vector<1x1xf32>
    %157 = arith.addf %150, %156 : vector<1x1xf32>
    %158 = vector.broadcast %2 : vector<1x4xf32> to vector<8x4xf32>
    %159 = arith.addf %119, %158 : vector<8x4xf32>
    %c0_48 = arith.constant 0 : index
    %c0_49 = arith.constant 0 : index
    %160 = vector.load %arg7[%c0_48, %c0_49] : memref<8x4xf32, #tpu.memory_space<vmem>>, vector<8x4xf32>
    tpu.vector_store %arg7[%c0_48, %c0_49], %159 {strides = array<i32>} : memref<8x4xf32, #tpu.memory_space<vmem>>, vector<8x4xf32>,
    %cst_50 = arith.constant dense<0xFF800000> : vector<8xf32>
    %161 = vector.multi_reduction <maximumf>, %159, %cst_50 [1] : vector<8x4xf32> to vector<8xf32>
    %162 = vector.shape_cast %161 : vector<8xf32> to vector<8x1xf32>
    %163 = vector.broadcast %162 : vector<8x1xf32> to vector<8x4xf32>
    %164 = arith.subf %159, %163 : vector<8x4xf32>
    %165 = math.exp %164 : vector<8x4xf32>
    %cst_51 = arith.constant dense<0.000000e+00> : vector<8xf32>
    %166 = vector.multi_reduction <add>, %165, %cst_51 [1] : vector<8x4xf32> to vector<8xf32>
    %167 = vector.shape_cast %166 : vector<8xf32> to vector<8x1xf32>
    %168 = math.log %167 : vector<8x1xf32>
    %169 = arith.addf %168, %162 : vector<8x1xf32>
    %170 = arith.mulf %159, %3 : vector<8x4xf32>
    %cst_52 = arith.constant dense<0.000000e+00> : vector<8xf32>
    %171 = vector.multi_reduction <add>, %170, %cst_52 [1] : vector<8x4xf32> to vector<8xf32>
    %172 = vector.shape_cast %171 : vector<8xf32> to vector<8x1xf32>
    %173 = arith.subf %169, %172 : vector<8x1xf32>
    %cst_53 = arith.constant dense<0.000000e+00> : vector<8xf32>
    %174 = vector.multi_reduction <add>, %173, %cst_53 [1] : vector<8x1xf32> to vector<8xf32>
    %175 = vector.shape_cast %174 : vector<8xf32> to vector<8x1xf32>
    %cst_54 = arith.constant dense<0.000000e+00> : vector<1xf32>
    %176 = vector.multi_reduction <add>, %175, %cst_54 [0] : vector<8x1xf32> to vector<1xf32>
    %177 = vector.shape_cast %176 : vector<1xf32> to vector<1x1xf32>
    %cst_55 = arith.constant 6.250000e-02 : f32
    %178 = vector.broadcast %cst_55 : f32 to vector<1x1xf32>
    %179 = arith.mulf %177, %178 : vector<1x1xf32>
    %180 = arith.addf %157, %179 : vector<1x1xf32>
    %c0_i32 = arith.constant 0 : i32
    %181 = arith.cmpi eq, %arg0, %c0_i32 : i32
    %182 = arith.extui %181 : i1 to i32
    %c0_i32_56 = arith.constant 0 : i32
    %183 = arith.cmpi ne, %182, %c0_i32_56 : i32
    scf.if %183 {
      %cst_61 = arith.constant 0.000000e+00 : f32
      %187 = vector.broadcast %cst_61 : f32 to vector<1x1xf32>
      %c0_62 = arith.constant 0 : index
      %c0_63 = arith.constant 0 : index
      %188 = vector.load %arg8[%c0_62, %c0_63] : memref<1x1xf32, #tpu.memory_space<vmem>>, vector<1x1xf32>
      tpu.vector_store %arg8[%c0_62, %c0_63], %187 {strides = array<i32>} : memref<1x1xf32, #tpu.memory_space<vmem>>, vector<1x1xf32>,
    } else {
    }
    %c0_57 = arith.constant 0 : index
    %c0_58 = arith.constant 0 : index
    %184 = vector.load %arg8[%c0_57, %c0_58] : memref<1x1xf32, #tpu.memory_space<vmem>>, vector<1x1xf32>
    %185 = arith.addf %184, %180 : vector<1x1xf32>
    %c0_59 = arith.constant 0 : index
    %c0_60 = arith.constant 0 : index
    %186 = vector.load %arg8[%c0_59, %c0_60] : memref<1x1xf32, #tpu.memory_space<vmem>>, vector<1x1xf32>
    tpu.vector_store %arg8[%c0_59, %c0_60], %185 {strides = array<i32>} : memref<1x1xf32, #tpu.memory_space<vmem>>, vector<1x1xf32>,
    return
  }
  func.func @transform_0(%arg0: i32) -> (i32, i32) {
    %c0_i32 = arith.constant 0 : i32
    %c0_i32_0 = arith.constant 0 : i32
    return %arg0, %c0_i32 : i32, i32
  }
  func.func @transform_1(%arg0: i32) -> (i32, i32) {
    %c0_i32 = arith.constant 0 : i32
    %c0_i32_0 = arith.constant 0 : i32
    return %arg0, %c0_i32 : i32, i32
  }
  func.func @transform_2(%arg0: i32) -> (i32, i32) {
    %c0_i32 = arith.constant 0 : i32
    %c0_i32_0 = arith.constant 0 : i32
    %c0_i32_1 = arith.constant 0 : i32
    return %c0_i32, %c0_i32_0 : i32, i32
  }
  func.func @transform_3(%arg0: i32) -> (i32, i32) {
    %c0_i32 = arith.constant 0 : i32
    %c0_i32_0 = arith.constant 0 : i32
    return %arg0, %c0_i32 : i32, i32
  }
  func.func @transform_4(%arg0: i32) -> (i32, i32) {
    %c0_i32 = arith.constant 0 : i32
    %c0_i32_0 = arith.constant 0 : i32
    %c0_i32_1 = arith.constant 0 : i32
    return %c0_i32, %c0_i32_0 : i32, i32
  }
  func.func @transform_5(%arg0: i32) -> (i32, i32) {
    %c0_i32 = arith.constant 0 : i32
    %c0_i32_0 = arith.constant 0 : i32
    %c0_i32_1 = arith.constant 0 : i32
    return %c0_i32, %c0_i32_0 : i32, i32
  }
  func.func @transform_6(%arg0: i32) -> (i32, i32) {
    %c0_i32 = arith.constant 0 : i32
    %c0_i32_0 = arith.constant 0 : i32
    return %arg0, %c0_i32 : i32, i32
  }
  func.func @transform_7(%arg0: i32) -> (i32, i32) {
    %c0_i32 = arith.constant 0 : i32
    %c0_i32_0 = arith.constant 0 : i32
    %c0_i32_1 = arith.constant 0 : i32
    return %c0_i32, %c0_i32_0 : i32, i32
  }
}

</mosaic_0001>

<bundles_post_ra>
// kernel: tpu_custom_call.1
= control target key start
LH: loop header
LB: loop body
LE: loop exit
PB: predicated region body
PF: predicated region fallthrough
CT: control target
= control target key end

     0   :  { %13 = vsyncpa [#allocation3], 0  ;;  %s1756_s0 = inlined_call_operand.vmem [shape: f32[16,4], index: 0, kind: input, shape index: {}]   ;;  %s1757_s1 = inlined_call_operand.vmem [shape: f32[16,16], index: 1, kind: input, shape index: {}]   ;;  %s1758_s2 = inlined_call_operand.vmem [shape: bf16[33,53], index: 2, kind: input, shape index: {}]   ;;  %s1759_s3 = inlined_call_operand.hbm [shape: f32[16,24], index: 3, kind: input, shape index: {}]   ;;  %s1760_s4 = inlined_call_operand.vmem [shape: bf16[33,61], index: 4, kind: input, shape index: {}]   ;;  %s1761_s5 = inlined_call_operand.vmem [shape: bf16[65,4], index: 5, kind: input, shape index: {}]   ;;  %s1762_s6 = inlined_call_operand.vmem [shape: f32[16,4], index: 6, kind: output, shape index: {0}]   ;;  %s1763_s7 = inlined_call_operand.hbm [shape: f32[1,1], index: 7, kind: output, shape index: {1}]  }
   0x1   :  { %15 = vsyncpa [#allocation3 + $0x1], 0 }
   0x2   :  { %16 = vsyncpa [#allocation4], 0  ;;  %s1473_s24 = smov 0   ;;  %s1475_s25 = smov 0  }
   0x3   :  { %s1477_s26 = smov 0   ;;  %s1479_s27 = smov 0  }
   0x4 LB: > { %s1492_s28 = sadd.s32 4294967295, %s1419_s27   ;;  %s1495_s29 = sadd.s32 1, %s1419_s27   ;;  %s1419_s27 = sphi %s1479_s27, %s1771_s27   ;;  %s1415_s26 = sphi %s1477_s26, %s1770_s26   ;;  %s1411_s25 = sphi %s1475_s25, %s1769_s25   ;;  %s1407_s24 = sphi %s1473_s24, %s1768_s24  }
   0x5   : > { %s99_s30 = ssub.s32 %s1419_s27, %s1495_s29  ;;  %s102_s8 = sadd.s32 1, %s1415_s26 }
   0x6   : > { %p100_p0 = scmp.eq.s32.totalorder %s99_s30, 0  ;;  %p109_p1 = scmp.ne.s32.totalorder %s1415_s26, %s1411_s25 }
   0x7   : > { %p110_p2 = scmp.eq.s32.totalorder %s1419_s27, 0  ;;  %p115_p3 = scmp.ne.s32.totalorder %s1411_s25, %s1407_s24 }
   0x8   : > { %s1505_s9 = scalar_select %p100_p0, %s1415_s26, %s102_s8  }
   0x9   : > { %p111_p4 = por %p110_p2, %p109_p1  ;;  %p116_p5 = scmp.eq.s32.totalorder %s1492_s28, 0 }
   0xa   : > { %p1243_p6 = scmp.lt.s32.totalorder %s1419_s27, 2  ;;  %s251_s11 = sand.u32 1, %s1415_s26  }
   0xb   : > { %p1509_p7 = por %p116_p5, %p115_p3  ;;  %s1120_s12 = sshll.u32 %s251_s11, 3 }
   0xc   : > { %s1121_s13 = sshll.u32 %s1419_s27, 7  ;;  %s255_s17 = scalar_lea.vmem [#allocation2], %s1120_s12 }
   0xd   : > { %s1518_s16 = scalar_lea.hbm %s1759_s3, %s1121_s13  ;;  %s262_s18 = sshll.u32 %s255_s17, 4  ;;  %s1520_s18 = int_to_ptr.vmem [resolvable:$true] %s262_s18 }
   0xe   : > { %p1522_p8 = pnand %p1243_p6, %p111_p4  ;;  %s252_s20 = scalar_lea.sflag [#allocation3], %s251_s11 }
   0xf   : > { %s1325_s21 = scalar_lea.hbm %s1518_s16, 128  ;;  %s1330_s24 = scalar_lea.hbm %s1759_s3, 256 }
  0x10   : > { %p1326_p11 = scmp.ne.s32.totalorder %s1518_s16, %s1325_s21  ;;  %p1327_p12 = pneg %p1522_p8 }
  0x11   : > { %p1331_p1 = scmp.lt.u32.totalorder %s1518_s16, %s1759_s3  ;;  %p1332_p2 = scmp.lt.u32.totalorder %s1330_s24, %s1325_s21 }
  0x12   : > { %p1328_p13 = pnand %p1327_p12, %p1326_p11  ;;  %p1334_p4 = scmp.lt.u32.totalorder %s1325_s21, %s1518_s16 }
  0x13   : > { %p1333_p3 = por %p1332_p2, %p1331_p1 }
  0x14   : > { %p1329_p0 = pneg %p1328_p13 }
  0x15   : > { %p1335_p5 = por %p1334_p4, %p1333_p3 }
  0x17   : > { %p1336_p6 = pnand %p1335_p5, %p1329_p0 }
  0x19   : > { %1339 = shalt.err (!%p1336_p6)
}
  0x1a   : > { %s1340_s11 = scalar_lea.vmem %s1520_s18, 128  ;;  %s1421_s12 = smov [#allocation2]  }
  0x1b   : > { %p1341_p11 = scmp.ne.s32.totalorder %s1520_s18, %s1340_s11  ;;  %s1345_s13 = sshll.u32 %s1421_s12, 4  ;;  %s1346_s13 = int_to_ptr.vmem [resolvable:$false] %s1345_s13 }
  0x1c   : > { %s1347_s14 = scalar_lea.vmem %s1346_s13, 256  ;;  %p1348_p10 = scmp.lt.s32.totalorder %s1520_s18, %s1346_s13 }
  0x1d   : > { %p1343_p13 = pnand %p1341_p11, %p1327_p12  ;;  %p1349_p1 = scmp.lt.s32.totalorder %s1347_s14, %s1340_s11 }
  0x1f   : > { %p1344_p9 = pneg %p1343_p13  ;;  %p1350_p2 = por %p1349_p1, %p1348_p10 }
  0x21   : > { %p1351_p3 = pnand %p1350_p2, %p1344_p9 }
  0x23   : > { %1354 = shalt.err (!%p1351_p3)
}
  0x24   : > { %1242 = dma.hbm_to_vmem [thread:$0]  (!%p1522_p8), %s1518_s16, 128, %s1520_s18, %s252_s20  }
  0x25   : > { %p1766_p0 = scmp.lt.s32.totalorder %s1419_s27, 3  ;;  %p1767_p4 = scmp.ge.s32.totalorder %s1419_s27, 1 }
  0x27   : > { %p268_p12 = pnand %p1767_p4, %p1766_p0 }
  0x28   : > { %s273_s15 = sand.u32 (!%p268_p12), 1, %s1411_s25  }
  0x29   : > { %271 = sbr.rel (%p268_p12) target bundleno = 1814 (0x716), region = 44  ;;  %s1558_s17 = sshll.u32 (!%p268_p12), %s273_s15, 3 }
  0x2a   : > { %s274_s21 = scalar_lea.sflag (!%p268_p12), [#allocation3], %s273_s15  ;;  %s277_s22 = scalar_lea.vmem (!%p268_p12), [#allocation2], %s1558_s17 }
  0x30   : > { %1398 = dma.done.wait (%p1509_p7), %s274_s21, 128  }
  0x31   : > { %1400 = vsyncadd (%p1509_p7), %s274_s21, 4294967168  ;;  %p315_p8 = scmp.lt.s32.totalorder %s1492_s28, 1  ;;  %v348_v0 = vlaneseq  ;;  %v1422_v1 = vmov 0.0   ;;  %vm1423_vm0 = vmmov 0   ;;  %v1291_v3 = vld [vmem:[%s1758_s2] sm:$0xff]   ;;  %vm358_vm1 = vcmask 130048  }
  0x32   : > { %1173 = vmatprep.subr.bf16.mxu0 %v1422_v1  ;;  %1175 = vmatprep.mubr.msk.bf16.mxu0 %vm1423_vm0, %v1422_v1  ;;  %v342_v6 = vld [vmem:[%s1758_s2 + $0x8] sm:$0xff]   ;;  %s1424_s8 = smov 112   ;;  %s1425_s11 = smov 80   ;;  %v1293_v24 = vld [vmem:[%s1761_s5] sm:$0xff]   ;;  %v344_v31 = vld [vmem:[%s1758_s2 + $0x10] sm:$0x1] }
  0x33   : > { %s316_s27 = scalar_select %p315_p8, %s1492_s28, 1  ;;  %1179 = vmatprep.subr.bf16.mxu1 %v1422_v1  ;;  %1181 = vmatprep.mubr.msk.bf16.mxu1 %vm1423_vm0, %v1422_v1  ;;  %v1573_v2 = vshrl.u32 %v348_v0, 7  ;;  %v345_v8 = vunpack.c.l.bf16 %v342_v6  ;;  %v1294_v25 = vld [vmem:[%s1761_s5 + $0x8] sm:$0xff]   ;;  %v1295_v28 = vld [vmem:[%s1760_s4] sm:$0xff]   ;;  %v346_v33 = vunpack.c.l.bf16 %v344_v31  ;;  %vm481_vm2 = vcmask 261120  }
  0x34   : > { %1174 = vmatpush3.bf16.msra.mxu0 %v1291_v3  ;;  %410 = vrot.lane.b32.xlu0 %v1291_v3, %s1424_s8  ;;  %v1617_v27 = vld [vmem:[%s1760_s4 + $0x8] sm:$0xf]  ;;  %v642_v30 = vld [vmem:[%s1760_s4 + $0xc] sm:$0xf]  ;;  %s1426_s30 = smov 104   ;;  %vm664_vm3 = vcmask 1043456  }
  0x35   : > { %s1575_s10 = sshll.u32 %s316_s27, 3  ;;  %v1585_v4 = vsub.s32 0, %v1573_v2  ;;  %1185 = vmatprep.subr.bf16.mxu0 %v1422_v1  ;;  %v1137_v29 = vcombine.low %v1617_v27, %v1617_v27  ;;  %v644_v32 = vunpack.c.l.bf16 %v642_v30  ;;  %v638_v43 = vld [vmem:[%s277_s22] sm:$0xff]  ;;  %vm660_vm4 = vcmask 195584   ;;  %s1428_s17 = smov 72  }
  0x36   : > { %s322_s19 = scalar_lea.vmem %s1757_s1, %s1575_s10  ;;  %v646_v45 = vpack.c.bf16 %v638_v43, %v638_v43  ;;  %v1427_v46 = vmov 4   ;;  %v1141_v61 = vcombine.low %v1617_v27, %v642_v30  ;;  %vm584_vm5 = vcmask 31744   ;;  %s318_s27 = scalar_lea.vmem %s1756_s0, %s1575_s10 }
  0x37   : > { %v339_v5 = vld [vmem:[%s322_s19] sm:$0xff]  ;;  %v351_v9 = vrot.slane %v345_v8, %v1585_v4  ;;  %v650_v34 = vrot.slane %v644_v32, %v1585_v4  ;;  %v465_v35 = vrot.slane %v346_v33, %v1585_v4  ;;  %v666_v44 = vsel %vm664_vm3, %v1137_v29, 0  ;;  %1289 = vset.pattern.permute.xlu1 %v1427_v46  ;;  %1290 = vset.pattern.permute.xlu0 %v1427_v46  ;;  %s326_s23 = scalar_lea.vmem %s1762_s6, %s1575_s10  ;;  %p1146_p7 = scmp.ne.s32.totalorder %s1492_s28, 0 }
  0x38   : > { %v347_v7 = vpack.c.bf16 %v339_v5, %v339_v5  ;;  %471 = vrot.lane.b32.xlu0 %v1291_v3, %s1425_s11  ;;  %vm619_vm6 = vcmask 39968   ;;  %vm980_vm7 = vcmask (!%p1146_p7), 0  }
  0x39   : > { %414 = vrot.lane.b32.xlu1 %v351_v9, %s1424_s8 }
  0x3a   : > { %1176 = vmatmul.mubr.msk.bf16.vlgmr.msra.gmra.mrb[0].mxu0 %vm358_vm1, %v347_v7 }
  0x3b   : > { %1189 = vmatprep.mubr.msk.bf16.mxu0 %vm1423_vm0, %v1422_v1 }
  0x3c   : > { %716 = vrot.lane.b32.xlu0 %v1295_v28, %s1426_s30 }
  0x3d   : > { %473 = vrot.lane.b32.xlu1 %v342_v6, %s1425_s11 }
  0x40   : > { %780 = vrot.lane.b32.xlu0 %v1295_v28, %s1428_s17 }
  0x41   : > { %718 = vrot.lane.b32.xlu1 %v1137_v29, %s1426_s30 }
  0x44   : > { %782 = vrot.lane.b32.xlu0 %v1141_v61, %s1428_s17 }
  0x45   : > { %722 = vrot.lane.b32.xlu1 %v650_v34, %s1426_s30 }
  0x49   : > { %478 = vrot.lane.b32.xlu1 %v465_v35, %s1425_s11 }
  0xa6   : > { %v411_v10 = vpop.permute.xlu0 %410 }
  0xa7   : > { %1180 = vmatpush3.bf16.msra.mxu1 %v411_v10 }
  0xa8   : > { %1193 = vmatprep.subr.bf16.mxu1 %v1422_v1 }
  0xaa   : > { %v472_v19 = vpop.permute.xlu0 %471 }
  0xab   : > { %1186 = vmatpush3.bf16.msra.mxu0 %v472_v19  ;;  %v415_v23 = vpop.permute.xlu1 %414  ;;  %v643_v19 = vld [vmem:[%s1760_s4 + $0x10] sm:$0x1] }
  0xac   : > { %1187 = vmatprep.subr.bf16.mxu0 %v1422_v1 }
  0xae   : > { %v717_v47 = vpop.permute.xlu0 %716 }
  0xaf   : > { %v474_v26 = vpop.permute.xlu1 %473 }
  0xb0   : > { %1188 = vmatpush3.bf16.msra.mxu0 %v474_v26 }
  0xb1   : > { %1201 = vmatprep.subr.bf16.mxu0 %v1422_v1 }
  0xb3   : > { %v719_v48 = vpop.permute.xlu1 %718 }
  0xb4   : > { %v729_v49 = vsel %vm664_vm3, %v719_v48, 0  ;;  %v336_v48 = vld [vmem:[%s1761_s5 + $0x20] sm:$0x1] }
  0xb7   : > { %v723_v50 = vpop.permute.xlu1 %722 }
  0xbb   : > { %v479_v51 = vpop.permute.xlu1 %478 }
 0x10d   : > { %v396_v11 = vpop.f32.mrb[0].mxu0 }
 0x10e   : > { %v397_v12 = vadd.f32 %v396_v11, %v351_v9  ;;  %v1177_v13 = vpop.f32.mrb[1].mxu0 }
 0x10f   : > { %v399_v14 = vpop.f32.mrb[2].mxu0  ;;  %v781_v13 = vpop.permute.xlu0 %780 }
 0x110   : > { %v1129_v15 = vmul.f32 -1.442695, %v397_v12  ;;  %v1178_v16 = vpop.f32.mrb[3].mxu0  ;;  %v1298_v14 = vld [vmem:[%s1761_s5 + $0x10] sm:$0xff]  }
 0x112   : > { %1301 = vpow2.f32 %v1129_v15  ;;  %v1299_v15 = vld [vmem:[%s1761_s5 + $0x18] sm:$0xff]  }
 0x113   : > { %v783_v16 = vpop.permute.xlu0 %782 }
 0x11c   : > { %v1302_v17 = vpop.eup %1301 }
 0x11d   : > { %v405_v18 = vadd.f32 1.0, %v1302_v17 }
 0x11f   : > { %1303 = vrcp.f32 %v405_v18 }
 0x129   : > { %v1599_v20 = vpop.eup %1303 }
 0x12a   : > { %v408_v21 = vmul.f32 %v1599_v20, %v339_v5 }
 0x12c   : > { %v409_v22 = vpack.c.bf16 %v408_v21, %v408_v21  ;;  %v645_v21 = vunpack.c.l.bf16 %v643_v19 }
 0x12e   : > { %1182 = vmatmul.mubr.msk.bf16.vlgmr.msra.gmra.mrb[0].mxu1 %vm358_vm1, %v409_v22  ;;  %v776_v22 = vrot.slane %v645_v21, %v1585_v4 }
 0x12f   : > { %1197 = vmatprep.mubr.msk.bf16.mxu1 %vm1423_vm0, %v1422_v1  ;;  %1194 = vmatpush3.bf16.msra.mxu1 %v1293_v24 }
 0x130   : > { %1195 = vmatprep.subr.bf16.mxu1 %v1422_v1  ;;  %787 = vrot.lane.b32.xlu0 %v776_v22, %s1428_s17 }
 0x133   : > { %1196 = vmatpush3.bf16.msra.mxu1 %v1294_v25 }
 0x134   : > { %1209 = vmatprep.subr.bf16.mxu1 %v1422_v1 }
 0x1a2   : > { %v788_v29 = vpop.permute.xlu0 %787 }
 0x201   : > { %v454_v36 = vpop.f32.mrb[0].mxu1 }
 0x202   : > { %v455_v37 = vadd.f32 %v454_v36, %v415_v23  ;;  %v1183_v38 = vpop.f32.mrb[1].mxu1 }
 0x203   : > { %v457_v39 = vpop.f32.mrb[2].mxu1 }
 0x204   : > { %v460_v40 = vmax.f32 %v455_v37, 0.0  ;;  %v1184_v41 = vpop.f32.mrb[3].mxu1 }
 0x206   : > { %v461_v42 = vpack.c.bf16 %v460_v40, %v460_v40 }
 0x208   : > { %1190 = vmatmul.mubr.msk.bf16.vlgmr.msra.gmra.mrb[4].mxu0 %vm481_vm2, %v461_v42  ;;  %1198 = vmatmul.mubr.msk.bf16.vlgmr.msra.gmra.mrb[4].mxu1 %vm481_vm2, %v461_v42 }
 0x209   : > { %1202 = vmatpush3.bf16.msra.mxu0 %v1295_v28  ;;  %1205 = vmatprep.mubr.msk.bf16.mxu0 %vm1423_vm0, %v1422_v1 }
 0x20a   : > { %1203 = vmatprep.subr.bf16.mxu0 %v1422_v1  ;;  %1213 = vmatprep.mubr.msk.bf16.mxu1 %vm1423_vm0, %v1422_v1 }
 0x20b   : > { %1210 = vmatpush3.bf16.msra.mxu1 %v717_v47 }
 0x20c   : > { %1211 = vmatprep.subr.bf16.mxu1 %v1422_v1 }
 0x20d   : > { %1204 = vmatpush3.bf16.msra.mxu0 %v666_v44  ;;  %v338_v44 = vld [vmem:[%s318_s27] sm:$0xff] }
 0x20e   : > { %1217 = vmatprep.subr.bf16.mxu0 %v1422_v1 }
 0x20f   : > { %1212 = vmatpush3.bf16.msra.mxu1 %v729_v49  ;;  %v337_v49 = vunpack.c.l.bf16 %v336_v48 }
 0x210   : > { %1206 = vmatmul.mubr.msk.bf16.vlgmr.msra.gmra.mrb[8].mxu0 %vm660_vm4, %v646_v45  ;;  %1225 = vmatprep.subr.bf16.mxu1 %v1422_v1 }
 0x211   : > { %1221 = vmatprep.mubr.msk.bf16.mxu0 %vm1423_vm0, %v1422_v1  ;;  %1218 = vmatpush3.bf16.msra.mxu0 %v781_v13 }
 0x212   : > { %1219 = vmatprep.subr.bf16.mxu0 %v1422_v1 }
 0x215   : > { %1220 = vmatpush3.bf16.msra.mxu0 %v783_v16 }
 0x2db   : > { %v519_v52 = vpop.f32.mrb[4].mxu0  ;;  %v571_v53 = vpop.f32.mrb[4].mxu1 }
 0x2dc   : > { %v1650_v54 = vadd.f32 %v519_v52, %v479_v51  ;;  %v1191_v55 = vpop.f32.mrb[5].mxu0  ;;  %v1199_v56 = vpop.f32.mrb[5].mxu1  ;;  %v947_v51 = vrot.slane %v337_v49, %v1585_v4 }
 0x2dd   : > { %v522_v57 = vpop.f32.mrb[6].mxu0  ;;  %v574_v58 = vpop.f32.mrb[6].mxu1 }
 0x2de   : > { %579 = vperm.xlu1 %1289, %v1650_v54   ;;  %v1192_v59 = vpop.f32.mrb[7].mxu0  ;;  %v1200_v60 = vpop.f32.mrb[7].mxu1  ;;  %v585_v11 = vsel %vm584_vm5, %v1650_v54, -inf  ;;  %v597_v46 = vmul.f32 %v1650_v54, %v338_v44 }
 0x2e0   : > { %v598_v47 = vsel %vm584_vm5, %v597_v46, 0.0 }
 0x2e3   : > { %v702_v62 = vpop.f32.mrb[8].mxu0 }
 0x2e4   : > { %v703_v63 = vadd.f32 %v702_v62, %v650_v34  ;;  %v1207_v0 = vpop.f32.mrb[9].mxu0 }
 0x2e5   : > { %v705_v3 = vpop.f32.mrb[10].mxu0 }
 0x2e6   : > { %v1139_v5 = vmul.f32 -1.442695, %v703_v63  ;;  %v1208_v6 = vpop.f32.mrb[11].mxu0  ;;  %v607_v63 = vsel %vm358_vm1, %v1599_v20, 0.0 }
 0x2e8   : > { %1305 = vpow2.f32 %v1139_v5 }
 0x2f2   : > { %v1306_v7 = vpop.eup %1305 }
 0x2f3   : > { %v711_v8 = vadd.f32 1.0, %v1306_v7 }
 0x2f5   : > { %1307 = vrcp.f32 %v711_v8 }
 0x2ff   : > { %v1656_v9 = vpop.eup %1307 }
 0x300   : > { %v714_v10 = vmul.f32 %v1656_v9, %v638_v43 }
 0x302   : > { %586 = vmax.xlane.f32.xlu1 %v585_v11  ;;  %v715_v12 = vpack.c.bf16 %v714_v10, %v714_v10  ;;  %v914_v11 = vsel %vm660_vm4, %v1656_v9, 0.0 }
 0x304   : > { %1214 = vmatmul.mubr.msk.bf16.vlgmr.msra.gmra.mrb[8].mxu1 %vm660_vm4, %v715_v12 }
 0x305   : > { %1229 = vmatprep.mubr.msk.bf16.mxu1 %vm1423_vm0, %v1422_v1  ;;  %1226 = vmatpush3.bf16.msra.mxu1 %v1298_v14 }
 0x306   : > { %1227 = vmatprep.subr.bf16.mxu1 %v1422_v1 }
 0x309   : > { %1228 = vmatpush3.bf16.msra.mxu1 %v1299_v15 }
 0x35d   : > { %v580_v17 = vpop.permute.xlu1 %579 }
 0x35e   : > { %v582_v18 = vmul.f32 %v580_v17, %v571_v53 }
 0x38f   : > { %v587_v39 = vpop.xlane.xlu1 %586 }
 0x390   : > { %v588_v40 = vsub.f32 %v1650_v54, %v587_v39 }
 0x392   : > { %v589_v41 = vmul.f32 1.442695, %v588_v40 }
 0x394   : > { %1309 = vpow2.f32 %v589_v41 }
 0x39e   : > { %v1310_v43 = vpop.eup %1309 }
 0x39f   : > { %v591_v45 = vsel %vm584_vm5, %v1310_v43, 0.0 }
 0x3d7   : > { %v765_v23 = vpop.f32.mrb[8].mxu1 }
 0x3d8   : > { %v766_v1 = vadd.f32 %v765_v23, %v723_v50  ;;  %v1215_v24 = vpop.f32.mrb[9].mxu1 }
 0x3d9   : > { %v768_v25 = vpop.f32.mrb[10].mxu1 }
 0x3da   : > { %v771_v26 = vmax.f32 %v766_v1, 0.0  ;;  %v1216_v27 = vpop.f32.mrb[11].mxu1 }
 0x3dc   : > { %v772_v28 = vpack.c.bf16 %v771_v26, %v771_v26 }
 0x3de   : > { %1222 = vmatmul.mubr.msk.bf16.vlgmr.msra.gmra.mrb[12].mxu0 %vm481_vm2, %v772_v28  ;;  %1230 = vmatmul.mubr.msk.bf16.vlgmr.msra.gmra.mrb[12].mxu1 %vm481_vm2, %v772_v28 }
 0x4b1   : > { %v827_v30 = vpop.f32.mrb[12].mxu0  ;;  %v879_v31 = vpop.f32.mrb[12].mxu1 }
 0x4b2   : > { %v1679_v32 = vadd.f32 %v827_v30, %v788_v29  ;;  %v1223_v33 = vpop.f32.mrb[13].mxu0  ;;  %v1231_v34 = vpop.f32.mrb[13].mxu1 }
 0x4b3   : > { %v830_v35 = vpop.f32.mrb[14].mxu0  ;;  %v882_v36 = vpop.f32.mrb[14].mxu1 }
 0x4b4   : > { %887 = vperm.xlu0 %1290, %v1679_v32   ;;  %v1224_v37 = vpop.f32.mrb[15].mxu0  ;;  %v1232_v38 = vpop.f32.mrb[15].mxu1  ;;  %v892_v42 = vsel %vm584_vm5, %v1679_v32, -inf  ;;  %v904_v61 = vmul.f32 %v1679_v32, %v338_v44 }
 0x4b6   : > { %v905_v62 = vsel %vm584_vm5, %v904_v61, 0.0 }
 0x4d3   : > { %893 = vmax.xlane.f32.xlu0 %v892_v42 }
 0x4d7   : > { %592 = vadd.xlane.f32.xlu0 %v591_v45 }
 0x4db   : > { %599 = vadd.xlane.f32.xlu0 %v598_v47 }
 0x533   : > { %v888_v50 = vpop.permute.xlu0 %887 }
 0x534   : > { %v890_v52 = vmul.f32 %v888_v50, %v879_v31 }
 0x536   : > { %v891_v53 = vadd.f32 %v890_v52, %v582_v18 }
 0x538   : > { %v948_v55 = vadd.f32 %v947_v51, %v891_v53 }
 0x53a   : > { %949 = vst.msk [vmem:[%s326_s23] sm:$0xff] %vm584_vm5, %v948_v55  ;;  %v950_v56 = vsel %vm584_vm5, %v948_v55, -inf  ;;  %v962_v0 = vmul.f32 %v948_v55, %v338_v44 }
 0x53b   : > { %951 = vmax.xlane.f32.xlu1 %v950_v56 }
 0x53c   : > { %v963_v3 = vsel %vm584_vm5, %v962_v0, 0.0 }
 0x560   : > { %v894_v57 = vpop.xlane.xlu0 %893 }
 0x561   : > { %v895_v58 = vsub.f32 %v1679_v32, %v894_v57 }
 0x563   : > { %v896_v59 = vmul.f32 1.442695, %v895_v58 }
 0x564   : > { %v593_v20 = vpop.xlane.xlu0 %592 }
 0x565   : > { %1311 = vpow2.f32 %v896_v59 }
 0x568   : > { %v600_v17 = vpop.xlane.xlu0 %599 }
 0x56f   : > { %v1312_v60 = vpop.eup %1311 }
 0x570   : > { %v898_v4 = vsel %vm584_vm5, %v1312_v60, 0.0 }
 0x571   : > { %899 = vadd.xlane.f32.xlu1 %v898_v4 }
 0x575   : > { %906 = vadd.xlane.f32.xlu1 %v905_v62 }
 0x579   : > { %608 = vadd.xlane.f32.xlu1 %v607_v63 }
 0x57d   : > { %964 = vadd.xlane.f32.xlu1 %v963_v3 }
 0x5c8   : > { %v1709_v5 = vpop.xlane.xlu1 %951 }
 0x5c9   : > { %v953_v6 = vsub.f32 %v948_v55, %v1709_v5 }
 0x5cb   : > { %v954_v7 = vmul.f32 1.442695, %v953_v6 }
 0x5cd   : > { %1313 = vpow2.f32 %v954_v7 }
 0x5ce   : > { %1315 = vlog2.f32 %v593_v20 }
 0x5d7   : > { %v1314_v8 = vpop.eup %1313 }
 0x5d8   : > { %v956_v10 = vsel %vm584_vm5, %v1314_v8, 0.0  ;;  %v1316_v13 = vpop.eup %1315 }
 0x5d9   : > { %957 = vadd.xlane.f32.xlu0 %v956_v10  ;;  %v595_v14 = vmul.f32 0.6931472, %v1316_v13 }
 0x5db   : > { %v596_v15 = vadd.f32 %v595_v14, %v587_v39 }
 0x5dd   : > { %915 = vadd.xlane.f32.xlu0 %v914_v11  ;;  %v602_v18 = vsub.f32 %v600_v17, %v596_v15  ;;  %v601_v33 = vsub.f32 %v596_v15, %v600_v17 }
 0x5df   : > { %v603_v21 = vmul.f32 1.442695, %v602_v18  ;;  %v630_v37 = vrot.slane %v601_v33, 4 }
 0x5e1   : > { %v631_v41 = vadd.f32 %v630_v37, %v601_v33 }
 0x5e3   : > { %v632_v46 = vrot.slane %v631_v41, 2 }
 0x5e5   : > { %v633_v52 = vadd.f32 %v632_v46, %v631_v41 }
 0x5e7   : > { %v634_v60 = vrot.slane %v633_v52, 1 }
 0x5e9   : > { %v635_v8 = vadd.f32 %v634_v60, %v633_v52 }
 0x5eb   : > { %v636_v17 = vmul.f32 0.0625, %v635_v8 }
 0x5fe   : > { %v900_v12 = vpop.xlane.xlu1 %899 }
 0x5ff   : > { %1317 = vlog2.f32 %v900_v12 }
 0x600   : > { %1319 = vpow2.f32 %v603_v21 }
 0x602   : > { %v907_v23 = vpop.xlane.xlu1 %906 }
 0x606   : > { %v609_v27 = vpop.xlane.xlu1 %608 }
 0x607   : > { %v610_v30 = vrot.slane %v609_v27, 4 }
 0x609   : > { %v1318_v16 = vpop.eup %1317  ;;  %v611_v35 = vadd.f32 %v610_v30, %v609_v27 }
 0x60a   : > { %v902_v19 = vmul.f32 0.6931472, %v1318_v16  ;;  %v1320_v25 = vpop.eup %1319  ;;  %v965_v20 = vpop.xlane.xlu1 %964 }
 0x60b   : > { %v605_v9 = vsub.f32 %v1650_v54, %v1320_v25  ;;  %v612_v39 = vrot.slane %v611_v35, 2 }
 0x60c   : > { %v903_v22 = vadd.f32 %v902_v19, %v894_v57 }
 0x60d   : > { %v606_v26 = vmul.f32 %v605_v9, %v605_v9  ;;  %v613_v44 = vadd.f32 %v612_v39, %v611_v35  ;;  %v1429_v35 = vmov (!%p1146_p7), 0.0  }
 0x60e   : > { %v909_v1 = vsub.f32 %v907_v23, %v903_v22  ;;  %v908_v43 = vsub.f32 %v903_v22, %v907_v23  ;;  %981 = vst.msk [vmem:[#allocation5] sm:$0x1] (!%p1146_p7), %vm980_vm7, %v1429_v35 }
 0x60f   : > { %v620_v29 = vsel %vm619_vm6, %v606_v26, 0.0  ;;  %v614_v49 = vrot.slane %v613_v44, 1 }
 0x610   : > { %v910_v24 = vmul.f32 1.442695, %v909_v1  ;;  %v621_v34 = vrot.slane %v620_v29, 4  ;;  %v936_v48 = vrot.slane %v908_v43, 4 }
 0x611   : > { %v615_v57 = vadd.f32 %v614_v49, %v613_v44 }
 0x612   : > { %1321 = vpow2.f32 %v910_v24  ;;  %v622_v38 = vadd.f32 %v621_v34, %v620_v29  ;;  %v937_v56 = vadd.f32 %v936_v48, %v908_v43 }
 0x613   : > { %v616_v0 = vmul.f32 0.00390625, %v615_v57 }
 0x614   : > { %v623_v42 = vrot.slane %v622_v38, 2  ;;  %v938_v63 = vrot.slane %v937_v56, 2 }
 0x616   : > { %v624_v47 = vadd.f32 %v623_v42, %v622_v38  ;;  %v939_v13 = vadd.f32 %v938_v63, %v937_v56 }
 0x618   : > { %v625_v53 = vrot.slane %v624_v47, 1  ;;  %v940_v21 = vrot.slane %v939_v13, 1 }
 0x61a   : > { %v626_v4 = vadd.f32 %v625_v53, %v624_v47  ;;  %v941_v9 = vadd.f32 %v940_v21, %v939_v13 }
 0x61c   : > { %v1322_v28 = vpop.eup %1321  ;;  %v627_v10 = vmul.f32 0.0625, %v626_v4  ;;  %v942_v29 = vmul.f32 0.0625, %v941_v9 }
 0x61d   : > { %v912_v31 = vsub.f32 %v1679_v32, %v1322_v28 }
 0x61e   : > { %v628_v14 = vadd.f32 %v627_v10, %v616_v0 }
 0x61f   : > { %v913_v36 = vmul.f32 %v912_v31, %v912_v31 }
 0x620   : > { %v637_v23 = vadd.f32 %v636_v17, %v628_v14 }
 0x621   : > { %v926_v40 = vsel %vm619_vm6, %v913_v36, 0.0 }
 0x622   : > { %v927_v54 = vrot.slane %v926_v40, 4 }
 0x624   : > { %v928_v50 = vadd.f32 %v927_v54, %v926_v40 }
 0x626   : > { %v929_v58 = vrot.slane %v928_v50, 2 }
 0x628   : > { %v930_v6 = vadd.f32 %v929_v58, %v928_v50 }
 0x62a   : > { %v931_v16 = vrot.slane %v930_v6, 1 }
 0x62c   : > { %v932_v1 = vadd.f32 %v931_v16, %v930_v6 }
 0x62e   : > { %v933_v27 = vmul.f32 0.0625, %v932_v1 }
 0x666   : > { %v958_v45 = vpop.xlane.xlu0 %957 }
 0x667   : > { %1323 = vlog2.f32 %v958_v45 }
 0x66a   : > { %v916_v32 = vpop.xlane.xlu0 %915 }
 0x66b   : > { %v917_v51 = vrot.slane %v916_v32, 4 }
 0x66d   : > { %v918_v55 = vadd.f32 %v917_v51, %v916_v32 }
 0x66f   : > { %v919_v59 = vrot.slane %v918_v55, 2 }
 0x671   : > { %v1324_v61 = vpop.eup %1323  ;;  %v920_v62 = vadd.f32 %v919_v59, %v918_v55 }
 0x672   : > { %v960_v3 = vmul.f32 0.6931472, %v1324_v61 }
 0x673   : > { %v921_v7 = vrot.slane %v920_v62, 1 }
 0x674   : > { %v961_v11 = vadd.f32 %v960_v3, %v1709_v5 }
 0x675   : > { %v922_v12 = vadd.f32 %v921_v7, %v920_v62 }
 0x676   : > { %v966_v15 = vsub.f32 %v961_v11, %v965_v20 }
 0x677   : > { %v923_v19 = vmul.f32 0.0026041667, %v922_v12 }
 0x678   : > { %v968_v18 = vrot.slane %v966_v15, 4 }
 0x679   : > { %v924_v25 = vadd.f32 %v923_v19, %v637_v23 }
 0x67a   : > { %v969_v22 = vadd.f32 %v968_v18, %v966_v15 }
 0x67b   : > { %v934_v5 = vadd.f32 %v933_v27, %v924_v25 }
 0x67c   : > { %v970_v24 = vrot.slane %v969_v22, 2 }
 0x67d   : > { %v943_v33 = vadd.f32 %v942_v29, %v934_v5 }
 0x67e   : > { %v971_v26 = vadd.f32 %v970_v24, %v969_v22 }
 0x680   : > { %v972_v28 = vrot.slane %v971_v26, 1  ;;  %979 = sbr.rel (%p1146_p7) target bundleno = 1671 (0x687), region = 52 }
 0x682   : > { %v973_v30 = vadd.f32 %v972_v28, %v971_v26 }
 0x684   : > { %v974_v31 = vmul.f32 0.0625, %v973_v30 }
 0x686   : > { %v975_v34 = vadd.f32 %v974_v31, %v943_v33 }
 0x687 PF: > { %v1430_v36 = vmov 1966171168   ;;  %s1431_s10 = smov 124   ;;  %v982_v42 = vld [vmem:[#allocation5] sm:$0x1]  ;;  %s1432_s24 = smov [#allocation5]  }
 0x688   : > { %v985_v37 = vunpack.c.l.s4 %v1430_v36  ;;  %s1018_s30 = sshll.u32 %s1432_s24, 4  ;;  %vm1002_vm8 = vcmask 0   ;;  %p1244_p9 = scmp.eq.s32.totalorder %s1492_s28, 1  ;;  %s1019_s30 = int_to_ptr.vmem [resolvable:$true] %s1018_s30 }
 0x689   : > { %s1355_s17 = scalar_lea.vmem %s1019_s30, 16  ;;  %s1361_s22 = scalar_lea.vmem %s1019_s30, 32 }
 0x68a   : > { %v986_v38 = vunpack.c.0.s8 %v985_v37  ;;  %p1356_p10 = scmp.ne.s32.totalorder %s1019_s30, %s1355_s17  ;;  %p1362_p11 = scmp.lt.s32.totalorder %s1019_s30, %s1019_s30 }
 0x68b   : > { %p1363_p13 = scmp.lt.s32.totalorder %s1361_s22, %s1355_s17 }
 0x68c   : > { %v989_v39 = vsub.s32 %v986_v38, %v1573_v2  ;;  %p1357_p5 = pnand %p1356_p10, %p1244_p9 }
 0x68d   : > { %p1364_p1 = por %p1363_p13, %p1362_p11 }
 0x68e   : > { %v990_v40 = vrot.slane %v975_v34, %v989_v39  ;;  %p1358_p6 = pneg %p1357_p5 }
 0x690   : > { %v997_v41 = vrot.slane %v990_v40, %v989_v39  ;;  %p1365_p2 = pnand %p1364_p1, %p1358_p6 }
 0x692   : > { %998 = vrot.lane.b32.xlu0 %v997_v41, %s1431_s10 }
 0x704   : > { %v999_v43 = vpop.permute.xlu0 %998 }
 0x705   : > { %v1001_v54 = vadd.f32 %v999_v43, %v982_v42 }
 0x707   : > { %1003 = vst.msk [vmem:[#allocation5] sm:$0x1] %vm1002_vm8, %v1001_v54 }
 0x708   : > { %1368 = shalt.err (!%p1365_p2)
}
 0x709   : > { %s1369_s12 = scalar_lea.hbm %s1763_s7, 16 }
 0x70a   : > { %p1370_p3 = scmp.ne.s32.totalorder %s1763_s7, %s1369_s12  ;;  %p1375_p12 = scmp.lt.u32.totalorder %s1369_s12, %s1763_s7 }
 0x70c   : > { %p1371_p0 = pnand %p1370_p3, %p1244_p9 }
 0x70e   : > { %p1372_p4 = pneg %p1371_p0 }
 0x710   : > { %p1377_p8 = pnand %p1375_p12, %p1372_p4 }
 0x712   : > { %1380 = shalt.err (!%p1377_p8)
}
 0x713   : > { %1236 = dma.vmem_to_hbm [thread:$0]  (%p1244_p9), %s1019_s30, 16, %s1763_s7, [#allocation4]  }
 0x714   : > { %1402 = dma.done.wait (%p1244_p9), [#allocation4], 16  }
 0x715   : > { %1404 = vsyncadd (%p1244_p9), [#allocation4], 4294967280 }
 0x716 PF: > { %p19_p7 = scmp.ge.s32.totalorder %s1495_s29, 4   ;;  %s1768_s24 = smov %s1411_s25 }
 0x717   : > { %s1769_s25 = smov %s1415_s26  ;;  %s1770_s26 = smov %s1505_s9 }
 0x718   : > { %s1771_s27 = smov %s1495_s29  ;;  %21 = sbr.rel (!%p19_p7) target bundleno = 4 (0x4), region = 103 }
 0x71f   :  { %1038 = vsyncpa [#allocation3], 1 }
 0x720   :  { %1040 = vsyncpa [#allocation3 + $0x1], 1 }
 0x721   :  { %1041 = vsyncpa [#allocation4], 1 }
 0x722   :  { %1043 = vsyncpa [#allocation4 + $0x1], 1 }

</bundles_post_ra>
